<compile_context>
chip_gen: v5e
topology: v5e:2x2
jax: 0.10.0
libtpu: 0.0.40
codegen_flags: <defaults>
</compile_context>

<pallas_src>
import functools

import jax
import jax.numpy as jnp
from jax.experimental import pallas as pl
from jax.experimental.pallas import tpu as pltpu

_MIB = 1024 * 1024
NCORES = 2                       # leading 'parallel' axis of pass 1 so both v7x TCs stream HBM
TARGET_BLOCK_BYTES = 4 * _MIB    # streamed-path block target (2-4 MiB sweet spot, v7x incl.)
FUSED_BLOCK_BYTES = 2 * _MIB     # output-store block of the pipelined fused path


def _cdiv(a, b):
    return -(-a // b)


@functools.lru_cache(maxsize=1)
def _vmem_capacity_bytes():
    """Physical VMEM per core (128 MiB on v5e/v6e, 64 MiB on v7x)."""
    try:
        cap = int(pltpu.get_tpu_info().vmem_capacity_bytes)
        if cap > 0:
            return cap
    except Exception:
        pass
    return 64 * _MIB             # conservative (v7x-sized) fallback


def _sublane(dtype):
    """Native sublane tile: 8 for 4-byte, 16 for 2-byte, 32 for 1-byte dtypes."""
    return max(8, 32 // jnp.dtype(dtype).itemsize)


def _pick_cols(n):
    # Widest lane-dense width that divides n => flatten/reshape is free (no pad
    # copy) and the exp stores run as wide unmasked vst.
    for c in (4096, 2048, 1024, 512, 256, 128):
        if n % c == 0:
            return c
    return 128   # ragged element count; pays one pad copy (see TODO below)


def _pad_neg_inf(flat, total):
    n = flat.shape[0]
    if total == n:
        return flat
    pad = jnp.full((total - n,), -jnp.inf, dtype=flat.dtype)
    return jnp.concatenate([flat, pad])


# --------------------------- fused, pipelined single kernel ---------------------------

def _fused_kernel(avg_ref, x_ref, o_ref, navg_ref, *, beta, rows, block_rows, sub, nb):
    """Whole slab VMEM-resident (block-invariant input => 1 HBM read).  Grid runs
    over output row blocks so the store DMA of block i overlaps the exp of
    block i+1.  Step 0 additionally computes the global max (elementwise
    accumulator trick, no big XLU reduce) and the EMA scalar (SMEM)."""
    i = pl.program_id(0)
    cols = x_ref.shape[1]

    @pl.when(i == 0)
    def _():
        rows_floor = (rows // sub) * sub          # static
        m = jnp.float32(-jnp.inf)
        if rows_floor > 0:
            xm = x_ref[0:rows_floor, :]           # input dtype; max is exact
            part = jnp.max(xm.reshape(rows_floor // sub, sub, cols), axis=0)
            m = jnp.maximum(m, jnp.max(part).astype(jnp.float32))
        if rows > rows_floor:                     # static tail (< sub rows)
            xt = x_ref[rows_floor:rows, :]
            m = jnp.maximum(m, jnp.max(xt).astype(jnp.float32))
        navg_ref[0, 0] = beta * avg_ref[0, 0] + (1.0 - beta) * (m * 0.5)

    na = navg_ref[0, 0]                           # EMA scalar (written at step 0)
    last = nb - 1
    rem = rows - last * block_rows                # static; valid rows of the last block

    @pl.when(i != last)
    def _():
        start = pl.multiple_of(i * block_rows, block_rows)
        blk = x_ref[pl.ds(start, block_rows), :].astype(jnp.float32)
        o_ref[...] = jnp.exp(blk - na).astype(o_ref.dtype)

    @pl.when(i == last)
    def _():
        # Static slice: never reads past the real rows; the untouched tail of the
        # output block is dropped by Pallas' partial-block writeback.
        blk = x_ref[last * block_rows:last * block_rows + rem, :].astype(jnp.float32)
        o_ref[0:rem, :] = jnp.exp(blk - na).astype(o_ref.dtype)


# --------------------------- streamed pass 1: partial max -----------------------------

def _partial_max_kernel(x_ref, pmax_ref, acc_ref, *, rows, block_rows, nblocks, kpc, sub):
    c = pl.program_id(0)
    k = pl.program_id(1)
    cols = x_ref.shape[1]

    @pl.when(k == 0)
    def _():
        acc_ref[...] = jnp.full(acc_ref.shape, -jnp.inf, acc_ref.dtype)

    b = c * kpc + k                       # logical block index (may overshoot nblocks-1)
    last = nblocks - 1
    rem = rows - last * block_rows        # static; valid rows of the tail block

    if nblocks > 1:
        # Full blocks: elementwise running max in the *input dtype* (no f32 copy),
        # pure VPU filler under the DMA stream.
        @pl.when(b < last)
        def _():
            x = x_ref[...]
            acc_ref[...] = jnp.maximum(
                acc_ref[...],
                jnp.max(x.reshape(block_rows // sub, sub, cols), axis=0))

    @pl.when(b == last)
    def _():
        xt = x_ref[0:rem, :]              # static tail slice: garbage rows never read
        if rem % sub == 0:
            acc_ref[...] = jnp.maximum(
                acc_ref[...],
                jnp.max(xt.reshape(rem // sub, sub, cols), axis=0))
        else:
            acc_ref[0:1, :] = jnp.maximum(acc_ref[0:1, :],
                                          jnp.max(xt, axis=0, keepdims=True))

    @pl.when(k == kpc - 1)
    def _():
        pmax_ref[0] = acc_ref[...].astype(jnp.float32)   # cast only the tiny partial


# --------------------------- streamed pass 2: exp -------------------------------------

def _exp_kernel(navg_ref, x_ref, o_ref):
    o_ref[...] = jnp.exp(x_ref[...].astype(jnp.float32) - navg_ref[0, 0]).astype(o_ref.dtype)


# -------------------------------------- wrapper ---------------------------------------

def normalized_exp(x, avg_max, beta=0.99, *,
                   fuse_limit_bytes=None,
                   target_block_bytes=TARGET_BLOCK_BYTES,
                   fused_block_bytes=FUSED_BLOCK_BYTES):
    """Mirrors NormalizedExp.forward.  Returns (y, new_avg_max): the PyTorch
    module mutates its `avg_max` buffer, so the new EMA state is returned."""
    orig_shape = x.shape
    dtype = x.dtype
    itemsize = jnp.dtype(dtype).itemsize
    n = x.size
    sub = _sublane(dtype)
    vmem_cap = _vmem_capacity_bytes()
    if fuse_limit_bytes is None:
        # Fused = 1 HBM read + 1 write (streamed = 2R + 1W).  cap//6 leaves room
        # for the resident slab (x2 if double-buffered) plus load/reshape temps
        # under the fused vmem limit: ~21 MiB on v5e/v6e, ~10.7 MiB on v7x.
        fuse_limit_bytes = vmem_cap // 6

    flat = x.reshape(-1)
    cols = _pick_cols(n)
    rows = _cdiv(n, cols)
    total = rows * cols
    slab_bytes = total * itemsize
    avg_2d = jnp.asarray(avg_max, jnp.float32).reshape(1, 1)

    if total != n:
        # TODO(synk): ragged element counts (n % 128 != 0) still pay one -inf pad
        # copy + one output slice copy; removable with in-kernel element masking.
        flat = _pad_neg_inf(flat, total)
    slab = flat.reshape(rows, cols)

    if slab_bytes <= fuse_limit_bytes:
        # ---------------- fused, pipelined single-kernel path ----------------
        tgt_rows = max(sub, (fused_block_bytes // (cols * itemsize)) // sub * sub)
        block_rows = rows if rows <= tgt_rows else tgt_rows
        nb = _cdiv(rows, block_rows)
        fused_vmem = max(32 * _MIB, min(vmem_cap - 8 * _MIB, (vmem_cap * 4) // 5))
        y_slab, navg = pl.pallas_call(
            functools.partial(_fused_kernel, beta=float(beta), rows=rows,
                              block_rows=block_rows, sub=sub, nb=nb),
            out_shape=(jax.ShapeDtypeStruct((rows, cols), dtype),
                       jax.ShapeDtypeStruct((1, 1), jnp.float32)),
            grid_spec=pltpu.PrefetchScalarGridSpec(
                num_scalar_prefetch=0,
                grid=(nb,),
                in_specs=[pl.BlockSpec(memory_space=pltpu.MemorySpace.SMEM),
                          # whole slab, block-invariant => DMA'd in exactly once
                          pl.BlockSpec((rows, cols), lambda i: (0, 0))],
                out_specs=[pl.BlockSpec((block_rows, cols), lambda i: (i, 0)),
                           pl.BlockSpec(memory_space=pltpu.MemorySpace.SMEM)]),
            compiler_params=pltpu.CompilerParams(
                # 'arbitrary': step 0 seeds the EMA scalar that later steps read.
                dimension_semantics=("arbitrary",),
                vmem_limit_bytes=int(fused_vmem)),
        )(avg_2d, slab)
        new_avg = navg[0, 0]
    else:
        # ---------------- streamed two-pass path (large tensors) ----------------
        tgt_rows = max(sub, (target_block_bytes // (cols * itemsize)) // sub * sub)
        block_rows = rows if rows <= tgt_rows else tgt_rows
        nblocks = _cdiv(rows, block_rows)
        kpc = _cdiv(nblocks, NCORES)          # reduction steps per core
        streamed_vmem = max(32 * _MIB, min(vmem_cap - 16 * _MIB, 64 * _MIB))

        # Pass 1: per-core partial maxes.  Leading 'parallel' axis of size NCORES
        # so both v7x TensorCores stream HBM (pure bookkeeping on v5e/v6e).
        # Over-provisioned grid steps are clamped in the index_map (re-reading the
        # last block is harmless for a max) and contribute nothing in-kernel.
        partials = pl.pallas_call(
            functools.partial(_partial_max_kernel, rows=rows, block_rows=block_rows,
                              nblocks=nblocks, kpc=kpc, sub=sub),
            out_shape=jax.ShapeDtypeStruct((NCORES, sub, cols), jnp.float32),
            grid_spec=pltpu.PrefetchScalarGridSpec(
                num_scalar_prefetch=0,
                grid=(NCORES, kpc),
                in_specs=[pl.BlockSpec(
                    (block_rows, cols),
                    lambda c, k: (jnp.minimum(c * kpc + k, nblocks - 1), 0))],
                out_specs=pl.BlockSpec((1, sub, cols), lambda c, k: (c, 0, 0)),
                scratch_shapes=[pltpu.VMEM((sub, cols), dtype)]),
            compiler_params=pltpu.CompilerParams(
                dimension_semantics=("parallel", "arbitrary"),
                vmem_limit_bytes=int(streamed_vmem)),
        )(slab)

        # Tiny glue (same jit): reduce the per-core partials + EMA scalar update.
        new_avg = beta * avg_2d[0, 0] + (1.0 - beta) * (jnp.max(partials) * 0.5)
        navg_2d = new_avg.reshape(1, 1)

        # Pass 2: elementwise exp, ~4 MiB blocks; output is exactly (rows, cols)
        # (partial last block is write-masked by Pallas), so no trailing slice.
        y_slab = pl.pallas_call(
            _exp_kernel,
            out_shape=jax.ShapeDtypeStruct((rows, cols), dtype),
            grid_spec=pltpu.PrefetchScalarGridSpec(
                num_scalar_prefetch=0,
                grid=(nblocks,),
                in_specs=[pl.BlockSpec(memory_space=pltpu.MemorySpace.SMEM),
                          pl.BlockSpec((block_rows, cols), lambda i: (i, 0))],
                out_specs=pl.BlockSpec((block_rows, cols), lambda i: (i, 0))),
            compiler_params=pltpu.CompilerParams(
                dimension_semantics=("parallel",),
                vmem_limit_bytes=int(streamed_vmem)),
        )(navg_2d, slab)

    if total == n:
        y = y_slab.reshape(orig_shape)        # free reshape, zero extra copies
    else:
        y = y_slab.reshape(-1)[:n].reshape(orig_shape)
    return y, new_avg


if __name__ == "__main__":
    beta = 0.99
    avg0 = jnp.float32(1.0)          # register_buffer('avg_max', tensor(1.0))
    k1, k2 = jax.random.split(jax.random.PRNGKey(0))

    def ref(xx):
        na = beta * avg0 + (1.0 - beta) * (jnp.max(xx) / 2.0)
        return jnp.exp(xx - na), na

    # 1) Small NCHW input, default fused path.
    x1 = jax.random.normal(k1, (2, 4, 16, 16), dtype=jnp.float32)
    ry1, ra1 = ref(x1)
    y1, a1 = jax.jit(lambda xx, aa: normalized_exp(xx, aa, beta))(x1, avg0)
    jax.block_until_ready((y1, a1))
    assert y1.shape == x1.shape and y1.dtype == x1.dtype
    assert jnp.allclose(a1, ra1, rtol=1e-6, atol=1e-6)
    assert jnp.allclose(y1, ry1, rtol=1e-5, atol=1e-5)

    # 2) Same input through the streamed two-pass fallback (forced).
    y2, a2 = jax.jit(lambda xx, aa: normalized_exp(xx, aa, beta,
                                                   fuse_limit_bytes=0))(x1, avg0)
    jax.block_until_ready((y2, a2))
    assert jnp.allclose(a2, ra1, rtol=1e-6, atol=1e-6)
    assert jnp.allclose(y2, ry1, rtol=1e-5, atol=1e-5)

    # 3) Multi-block coverage (tail block not a multiple of the block size) on
    #    both the pipelined fused path and the streamed path, via tiny blocks.
    x3 = jax.random.normal(k2, (4, 4, 60, 128), dtype=jnp.float32)   # 30 rows x 4096 cols
    ry3, ra3 = ref(x3)
    y3, a3 = jax.jit(lambda xx, aa: normalized_exp(xx, aa, beta,
                                                   fused_block_bytes=64 * 1024))(x3, avg0)
    jax.block_until_ready((y3, a3))
    assert jnp.allclose(a3, ra3, rtol=1e-6, atol=1e-6)
    assert jnp.allclose(y3, ry3, rtol=1e-5, atol=1e-5)

    y4, a4 = jax.jit(lambda xx, aa: normalized_exp(xx, aa, beta, fuse_limit_bytes=0,
                                                   target_block_bytes=64 * 1024))(x3, avg0)
    jax.block_until_ready((y4, a4))
    assert jnp.allclose(a4, ra3, rtol=1e-6, atol=1e-6)
    assert jnp.allclose(y4, ry3, rtol=1e-5, atol=1e-5)

    print("KERNEL_OK")
</pallas_src>

<mosaic_0001>
module attributes {stable_mosaic.version = 11 : i64} {
  func.func @_fused_kernel(%arg0: i32, %arg1: memref<1x1xf32, #tpu.memory_space<smem>>, %arg2: memref<1x2048xf32, #tpu.memory_space<vmem>>, %arg3: memref<1x2048xf32, #tpu.memory_space<vmem>>, %arg4: memref<1x1xf32, #tpu.memory_space<smem>>) attributes {dimension_semantics = [#tpu.dimension_semantics<arbitrary>], iteration_bounds = array<i64: 1>, scalar_prefetch = 0 : i64, scratch_operands = 0 : i64, tpu.core_type = #tpu.core_type<tc>, window_params = [{transform_indices = @transform_0, window_bounds = array<i64: 1, 1>}, {pipeline_mode = #tpu.pipeline_mode<synchronous>, transform_indices = @transform_1, window_bounds = array<i64: 1, 2048>}, {transform_indices = @transform_2, window_bounds = array<i64: 1, 2048>}, {transform_indices = @transform_3, window_bounds = array<i64: 1, 1>}]} {
    %c0_i32 = arith.constant 0 : i32
    %0 = arith.cmpi eq, %arg0, %c0_i32 : i32
    %1 = arith.extui %0 : i1 to i32
    %c0_i32_0 = arith.constant 0 : i32
    %2 = arith.cmpi ne, %1, %c0_i32_0 : i32
    scf.if %2 {
      %c0_6 = arith.constant 0 : index
      %c0_7 = arith.constant 0 : index
      %10 = vector.load %arg2[%c0_6, %c0_7] : memref<1x2048xf32, #tpu.memory_space<vmem>>, vector<1x2048xf32>
      %11 = vector.shape_cast %10 : vector<1x2048xf32> to vector<1x1x2048xf32>
      %cst = arith.constant dense<0xFF800000> : vector<1xf32>
      %12 = vector.multi_reduction <maximumf>, %11, %cst [1, 2] : vector<1x1x2048xf32> to vector<1xf32>
      %13 = vector.shape_cast %12 : vector<1xf32> to vector<1x1x1xf32>
      %14 = vector.extract %13[0, 0, 0] : f32 from vector<1x1x1xf32>
      %cst_8 = arith.constant 0xFF800000 : f32
      %15 = arith.maximumf %cst_8, %14 : f32
      %c0_9 = arith.constant 0 : index
      %c0_10 = arith.constant 0 : index
      %16 = memref.load %arg1[%c0_9, %c0_10] : memref<1x1xf32, #tpu.memory_space<smem>>
      %cst_11 = arith.constant 9.900000e-01 : f32
      %17 = arith.mulf %cst_11, %16 : f32
      %cst_12 = arith.constant 5.000000e-01 : f32
      %18 = arith.mulf %15, %cst_12 : f32
      %cst_13 = arith.constant 0.00999999977 : f32
      %19 = arith.mulf %cst_13, %18 : f32
      %20 = arith.addf %17, %19 : f32
      %c0_14 = arith.constant 0 : index
      %c0_15 = arith.constant 0 : index
      %21 = memref.load %arg4[%c0_14, %c0_15] : memref<1x1xf32, #tpu.memory_space<smem>>
      memref.store %20, %arg4[%c0_14, %c0_15] : memref<1x1xf32, #tpu.memory_space<smem>>
    } else {
    }
    %c0 = arith.constant 0 : index
    %c0_1 = arith.constant 0 : index
    %3 = memref.load %arg4[%c0, %c0_1] : memref<1x1xf32, #tpu.memory_space<smem>>
    %c0_i32_2 = arith.constant 0 : i32
    %4 = arith.cmpi ne, %arg0, %c0_i32_2 : i32
    %5 = arith.extui %4 : i1 to i32
    %c0_i32_3 = arith.constant 0 : i32
    %6 = arith.cmpi ne, %5, %c0_i32_3 : i32
    scf.if %6 {
      %c1_i32 = arith.constant 1 : i32
      %10 = arith.muli %arg0, %c1_i32 : i32
      %11 = tpu.assume_multiple %10, 1 : i32
      %12 = arith.index_cast %11 : i32 to index
      %c0_6 = arith.constant 0 : index
      %13 = vector.load %arg2[%12, %c0_6] : memref<1x2048xf32, #tpu.memory_space<vmem>>, vector<1x2048xf32>
      %14 = vector.broadcast %3 : f32 to vector<1x2048xf32>
      %15 = arith.subf %13, %14 : vector<1x2048xf32>
      %16 = math.exp %15 : vector<1x2048xf32>
      %c0_7 = arith.constant 0 : index
      %c0_8 = arith.constant 0 : index
      %17 = vector.load %arg3[%c0_7, %c0_8] : memref<1x2048xf32, #tpu.memory_space<vmem>>, vector<1x2048xf32>
      tpu.vector_store %arg3[%c0_7, %c0_8], %16 {strides = array<i32>} : memref<1x2048xf32, #tpu.memory_space<vmem>>, vector<1x2048xf32>,
    } else {
    }
    %c0_i32_4 = arith.constant 0 : i32
    %7 = arith.cmpi eq, %arg0, %c0_i32_4 : i32
    %8 = arith.extui %7 : i1 to i32
    %c0_i32_5 = arith.constant 0 : i32
    %9 = arith.cmpi ne, %8, %c0_i32_5 : i32
    scf.if %9 {
      %c0_6 = arith.constant 0 : index
      %c0_7 = arith.constant 0 : index
      %10 = vector.load %arg2[%c0_6, %c0_7] : memref<1x2048xf32, #tpu.memory_space<vmem>>, vector<1x2048xf32>
      %11 = vector.broadcast %3 : f32 to vector<1x2048xf32>
      %12 = arith.subf %10, %11 : vector<1x2048xf32>
      %13 = math.exp %12 : vector<1x2048xf32>
      %c0_8 = arith.constant 0 : index
      %c0_9 = arith.constant 0 : index
      %14 = vector.load %arg3[%c0_8, %c0_9] : memref<1x2048xf32, #tpu.memory_space<vmem>>, vector<1x2048xf32>
      tpu.vector_store %arg3[%c0_8, %c0_9], %13 {strides = array<i32>} : memref<1x2048xf32, #tpu.memory_space<vmem>>, vector<1x2048xf32>,
    } else {
    }
    return
  }
  func.func @transform_0(%arg0: i32) -> (i32, i32) {
    %c0_i32 = arith.constant 0 : i32
    %c0_i32_0 = arith.constant 0 : i32
    %c0_i32_1 = arith.constant 0 : i32
    return %c0_i32, %c0_i32_0 : i32, i32
  }
  func.func @transform_1(%arg0: i32) -> (i32, i32) {
    %c0_i32 = arith.constant 0 : i32
    %c0_i32_0 = arith.constant 0 : i32
    %c0_i32_1 = arith.constant 0 : i32
    return %c0_i32, %c0_i32_0 : i32, i32
  }
  func.func @transform_2(%arg0: i32) -> (i32, i32) {
    %c0_i32 = arith.constant 0 : i32
    %c0_i32_0 = arith.constant 0 : i32
    return %arg0, %c0_i32 : i32, i32
  }
  func.func @transform_3(%arg0: i32) -> (i32, i32) {
    %c0_i32 = arith.constant 0 : i32
    %c0_i32_0 = arith.constant 0 : i32
    %c0_i32_1 = arith.constant 0 : i32
    return %c0_i32, %c0_i32_0 : i32, i32
  }
}

</mosaic_0001>

<bundles_post_ra>
// kernel: _lambda_.1
= control target key start
LH: loop header
LB: loop body
LE: loop exit
PB: predicated region body
PF: predicated region fallthrough
CT: control target
= control target key end

     0   :  { %vm55_vm0 = vcmask 1040384   ;;  %s252_s0 = inlined_call_operand.<no memory space> [shape: f32[1,1], index: 0, kind: input, shape index: {}]   ;;  %s253_s1 = inlined_call_operand.vmem [shape: f32[1,2048], index: 1, kind: input, shape index: {}]   ;;  %s254_s2 = inlined_call_operand.vmem [shape: f32[1,2048], index: 2, kind: output, shape index: {0}]   ;;  %s255_s3 = inlined_call_operand.hbm [shape: f32[1,1], index: 3, kind: output, shape index: {1}]  }
   0x1   :  { %v199_v0 = vld [vmem:[%s253_s1] sm:$0xff]  ;;  %v204_v1 = vld [vmem:[%s253_s1 + $0x8] sm:$0xff] }
   0x2   :  { %10 = vsyncpa [#allocation4], 0  ;;  %v23_v2 = vperm.slane %v199_v0, 0  ;;  %v24_v3 = vperm.slane %v199_v0, 1  ;;  %v25_v4 = vperm.slane %v199_v0, 2  ;;  %v26_v5 = vperm.slane %v199_v0, 3 }
   0x3   :  { %v27_v6 = vperm.slane %v199_v0, 4  ;;  %v28_v7 = vperm.slane %v199_v0, 5  ;;  %v29_v8 = vperm.slane %v199_v0, 6  ;;  %v30_v9 = vperm.slane %v199_v0, 7  ;;  %s97_s18 = smul.f32 0.99, %s252_s0 }
   0x4   :  { %v31_v10 = vperm.slane %v204_v1, 0  ;;  %v32_v11 = vperm.slane %v204_v1, 1  ;;  %v33_v12 = vperm.slane %v204_v1, 2  ;;  %v34_v13 = vperm.slane %v204_v1, 3  ;;  %s142_s22 = sshll.u32 %s255_s3, 4  ;;  %s175_s25 = smov [#allocation3]   ;;  %s143_s22 = int_to_ptr.hbm [resolvable:$true] %s142_s22 }
   0x5   :  { %v35_v14 = vperm.slane %v204_v1, 4  ;;  %v36_v15 = vperm.slane %v204_v1, 5  ;;  %v37_v16 = vperm.slane %v204_v1, 6  ;;  %v38_v17 = vperm.slane %v204_v1, 7 }
   0x6   :  { %v56_v18 = vsel %vm55_vm0, %v23_v2, -inf  ;;  %v57_v19 = vsel %vm55_vm0, %v24_v3, -inf  ;;  %v58_v20 = vsel %vm55_vm0, %v25_v4, -inf  ;;  %v59_v21 = vsel %vm55_vm0, %v26_v5, -inf }
   0x7   :  { %v60_v22 = vsel %vm55_vm0, %v27_v6, -inf  ;;  %v62_v23 = vsel %vm55_vm0, %v28_v7, -inf  ;;  %v64_v24 = vsel %vm55_vm0, %v29_v8, -inf  ;;  %v66_v25 = vsel %vm55_vm0, %v30_v9, -inf }
   0x8   :  { %v61_v26 = vmax.f32 %v56_v18, %v60_v22  ;;  %v63_v27 = vmax.f32 %v57_v19, %v62_v23  ;;  %v65_v28 = vmax.f32 %v58_v20, %v64_v24  ;;  %v67_v29 = vmax.f32 %v59_v21, %v66_v25 }
   0x9   :  { %v68_v30 = vsel %vm55_vm0, %v31_v10, -inf  ;;  %v70_v31 = vsel %vm55_vm0, %v32_v11, -inf  ;;  %v72_v32 = vsel %vm55_vm0, %v33_v12, -inf  ;;  %v74_v33 = vsel %vm55_vm0, %v34_v13, -inf }
   0xa   :  { %v69_v34 = vmax.f32 %v61_v26, %v68_v30  ;;  %v71_v35 = vmax.f32 %v63_v27, %v70_v31  ;;  %v73_v36 = vmax.f32 %v65_v28, %v72_v32  ;;  %v75_v37 = vmax.f32 %v67_v29, %v74_v33 }
   0xb   :  { %v76_v38 = vsel %vm55_vm0, %v35_v14, -inf  ;;  %v78_v39 = vsel %vm55_vm0, %v36_v15, -inf  ;;  %v80_v40 = vsel %vm55_vm0, %v37_v16, -inf  ;;  %v82_v41 = vsel %vm55_vm0, %v38_v17, -inf }
   0xc   :  { %v77_v42 = vmax.f32 %v69_v34, %v76_v38  ;;  %v79_v43 = vmax.f32 %v71_v35, %v78_v39  ;;  %v81_v44 = vmax.f32 %v73_v36, %v80_v40  ;;  %v83_v45 = vmax.f32 %v75_v37, %v82_v41 }
   0xe   :  { %v84_v46 = vmax.f32 %v77_v42, %v79_v43  ;;  %v85_v47 = vmax.f32 %v81_v44, %v83_v45 }
  0x10   :  { %v86_v48 = vmax.f32 %v84_v46, %v85_v47 }
  0x12   :  { %87 = vmax.xlane.f32.xlu0 %v86_v48 }
  0x85   :  { %v88_v49 = vpop.xlane.xlu0 %87 }
  0x86   :  { %v89_v50 = vrot.slane %v88_v49, 4 }
  0x88   :  { %v90_v51 = vmax.f32 %v88_v49, %v89_v50 }
  0x8a   :  { %v91_v52 = vrot.slane %v90_v51, 2 }
  0x8c   :  { %v92_v53 = vmax.f32 %v90_v51, %v91_v52 }
  0x8e   :  { %v93_v54 = vrot.slane %v92_v53, 1 }
  0x90   :  { %v94_v55 = vmax.f32 %v92_v53, %v93_v54 }
  0x92   :  { %154 = vpush %v94_v55 }
  0xc3   :  { %s155_s1 = spop %154 }
  0xc4   :  { %s98_s19 = smul.f32 0.5, %s155_s1 }
  0xc6   :  { %s99_s23 = smul.f32 0.01, %s98_s19 }
  0xc8   :  { %s100_s24 = sadd.f32 %s99_s23, %s97_s18 }
  0xca   :  { %102 = sst [smem:[#allocation3]] %s100_s24  ;;  %v126_v56 = vstv %s100_s24 }
  0xcb   :  { %v127_v57 = vsub.f32 %v199_v0, %v126_v56  ;;  %v128_v58 = vsub.f32 %v204_v1, %v126_v56  ;;  %145 = dma.smem_to_hbm %s175_s25, 16, %s143_s22, [#allocation4]  }
  0xcd   :  { %v129_v59 = vmul.f32 1.442695, %v127_v57  ;;  %v131_v60 = vmul.f32 1.442695, %v128_v58 }
  0xcf   :  { %157 = vpow2.f32 %v129_v59 }
  0xd0   :  { %159 = vpow2.f32 %v131_v60 }
  0xd5   :  { %v158_v61 = vpop.eup %157 }
  0xd6   :  { %v160_v62 = vpop.eup %159  ;;  %133 = vst [vmem:[%s254_s2] sm:$0xff] %v158_v61 }
  0xd7   :  { %134 = vst [vmem:[%s254_s2 + $0x8] sm:$0xff] %v160_v62 }
  0xd8   :  { %173 = dma.done.wait [#allocation4], 16  }
  0xd9   :  { %174 = vsyncadd [#allocation4], 4294967280 }
  0xda   :  { %152 = sfence }
  0xdb   :  { %153 = vsyncpa [#allocation4], 1 }

</bundles_post_ra>
